<compile_context>
chip_gen: v7x
topology: tpu7x:2x2x1
jax: 0.10.0
libtpu: 0.0.40
codegen_flags: <defaults>
</compile_context>

<pallas_src>
import jax
import jax.numpy as jnp
from jax.experimental import pallas as pl
from jax.experimental.pallas import tpu as pltpu

D = 19          # [objectness, x, y, z, 3x shape, 2x size, 2x material, 8x color]
MAT_LO, MAT_HI = 9, 11
N_MAT = MAT_HI - MAT_LO   # 2 material attributes: rubber, metal


def _material_kernel(zt_ref, at_ref, out_ref):
    # zt_ref / at_ref tile: (2, TB) -- material features / one-hot, batch on lanes.
    # out_ref tile: (1, TB) -- lane-dense output.
    zt = zt_ref[...]
    at = at_ref[...]
    # Unrolled 2-term dot along the tiny leading axis: pure VPU work, no XLU.
    out_ref[...] = at[0:1, :] * zt[0:1, :] + at[1:2, :] * zt[1:2, :]


def _round_up(x, m):
    return ((x + m - 1) // m) * m


def slot_attention_material(z, a, *, tb=1024):
    """z: (B, 19) f32; a: (B, 2) f32 one-hot.  Returns (B,) = (a * z[:,9:11]).sum(1)."""
    B, d = z.shape
    assert d == D
    assert a.shape == (B, N_MAT)

    # Trim to the 2 used features and put batch on the lane (last) axis.
    z_mat_t = jnp.transpose(z[:, MAT_LO:MAT_HI].astype(jnp.float32))  # (2, B)
    a_t = jnp.transpose(a.astype(jnp.float32))                        # (2, B)

    # Lane-dense tiling: batch tile is a multiple of 128 lanes; pad B instead
    # of requiring divisibility.
    tb_eff = min(tb, _round_up(B, 128))
    Bp = _round_up(B, tb_eff)
    if Bp != B:
        pad = Bp - B
        z_mat_t = jnp.pad(z_mat_t, ((0, 0), (0, pad)))
        a_t = jnp.pad(a_t, ((0, 0), (0, pad)))

    out = pl.pallas_call(
        _material_kernel,
        out_shape=jax.ShapeDtypeStruct((1, Bp), jnp.float32),
        grid_spec=pltpu.PrefetchScalarGridSpec(
            num_scalar_prefetch=0,
            grid=(Bp // tb_eff,),
            in_specs=[
                pl.BlockSpec((N_MAT, tb_eff), lambda i: (0, i)),  # z material (2, TB)
                pl.BlockSpec((N_MAT, tb_eff), lambda i: (0, i)),  # one-hot a  (2, TB)
            ],
            out_specs=pl.BlockSpec((1, tb_eff), lambda i: (0, i)),
        ),
        compiler_params=pltpu.CompilerParams(
            dimension_semantics=("parallel",)),
    )(z_mat_t, a_t)
    return out[0, :B]  # matches torch's (B,) result


def _reference(z, a):
    return (a * z[:, MAT_LO:MAT_HI]).sum(axis=1)


if __name__ == "__main__":
    key = jax.random.PRNGKey(0)
    kz, ka = jax.random.split(key, 2)

    B = 16
    z = jax.random.uniform(kz, (B, D), dtype=jnp.float32)
    # One-hot material attribute tensor, expanded to the batch size.
    mat_idx = jax.random.randint(ka, (B,), 0, N_MAT)
    a = jax.nn.one_hot(mat_idx, N_MAT, dtype=jnp.float32)

    out = slot_attention_material(z, a)
    jax.block_until_ready(out)

    ref = _reference(z, a)
    assert out.shape == (B,)
    assert jnp.allclose(out, ref, atol=1e-6, rtol=1e-6)

    print("KERNEL_OK")
</pallas_src>

<mosaic_0001>
module attributes {stable_mosaic.version = 11 : i64} {
  func.func @_material_kernel(%arg0: i32, %arg1: memref<2x128xf32, #tpu.memory_space<vmem>>, %arg2: memref<2x128xf32, #tpu.memory_space<vmem>>, %arg3: memref<1x128xf32, #tpu.memory_space<vmem>>) attributes {dimension_semantics = [#tpu.dimension_semantics<parallel>], iteration_bounds = array<i64: 1>, scalar_prefetch = 0 : i64, scratch_operands = 0 : i64, tpu.core_type = #tpu.core_type<tc>, window_params = [{transform_indices = @transform_0, window_bounds = array<i64: 2, 128>}, {transform_indices = @transform_1, window_bounds = array<i64: 2, 128>}, {transform_indices = @transform_2, window_bounds = array<i64: 1, 128>}]} {
    %c0 = arith.constant 0 : index
    %c0_0 = arith.constant 0 : index
    %0 = vector.load %arg1[%c0, %c0_0] : memref<2x128xf32, #tpu.memory_space<vmem>>, vector<2x128xf32>
    %c0_1 = arith.constant 0 : index
    %c0_2 = arith.constant 0 : index
    %1 = vector.load %arg2[%c0_1, %c0_2] : memref<2x128xf32, #tpu.memory_space<vmem>>, vector<2x128xf32>
    %2 = vector.extract_strided_slice %1 {offsets = [0, 0], sizes = [1, 128], strides = [1, 1]} : vector<2x128xf32> to vector<1x128xf32>
    %3 = vector.extract_strided_slice %0 {offsets = [0, 0], sizes = [1, 128], strides = [1, 1]} : vector<2x128xf32> to vector<1x128xf32>
    %4 = arith.mulf %2, %3 : vector<1x128xf32>
    %5 = vector.extract_strided_slice %1 {offsets = [1, 0], sizes = [1, 128], strides = [1, 1]} : vector<2x128xf32> to vector<1x128xf32>
    %6 = vector.extract_strided_slice %0 {offsets = [1, 0], sizes = [1, 128], strides = [1, 1]} : vector<2x128xf32> to vector<1x128xf32>
    %7 = arith.mulf %5, %6 : vector<1x128xf32>
    %8 = arith.addf %4, %7 : vector<1x128xf32>
    %c0_3 = arith.constant 0 : index
    %c0_4 = arith.constant 0 : index
    %9 = vector.load %arg3[%c0_3, %c0_4] : memref<1x128xf32, #tpu.memory_space<vmem>>, vector<1x128xf32>
    tpu.vector_store %arg3[%c0_3, %c0_4], %8 {strides = array<i32>} : memref<1x128xf32, #tpu.memory_space<vmem>>, vector<1x128xf32>,
    return
  }
  func.func @transform_0(%arg0: i32) -> (i32, i32) {
    %c0_i32 = arith.constant 0 : i32
    %c0_i32_0 = arith.constant 0 : i32
    return %c0_i32, %arg0 : i32, i32
  }
  func.func @transform_1(%arg0: i32) -> (i32, i32) {
    %c0_i32 = arith.constant 0 : i32
    %c0_i32_0 = arith.constant 0 : i32
    return %c0_i32, %arg0 : i32, i32
  }
  func.func @transform_2(%arg0: i32) -> (i32, i32) {
    %c0_i32 = arith.constant 0 : i32
    %c0_i32_0 = arith.constant 0 : i32
    return %c0_i32, %arg0 : i32, i32
  }
}

</mosaic_0001>

<bundles_post_ra>
// kernel: tpu_custom_call.1
= control target key start
LH: loop header
LB: loop body
LE: loop exit
PB: predicated region body
PF: predicated region fallthrough
CT: control target
= control target key end

     0   :  { %7 = vsyncpa [#allocation3], 0  ;;  %s141_s0 = inlined_call_operand.hbm [shape: f32[2,128], index: 0, kind: input, shape index: {}]   ;;  %s142_s1 = inlined_call_operand.vmem [shape: f32[2,128], index: 1, kind: input, shape index: {}]   ;;  %s143_s2 = inlined_call_operand.hbm [shape: f32[1,128], index: 2, kind: output, shape index: {}]  }
   0x1   :  { %8 = vsyncpa [#allocation4], 0  ;;  %s97_s9 = smov [#allocation2]   ;;  %s49_s13 = scalar_lea.hbm %s141_s0, 32 }
   0x2   :  { %s15_s10 = sshll.u32 %s97_s9, 4  ;;  %p50_p0 = scmp.ne.s32.totalorder %s141_s0, %s49_s13  ;;  %s16_s10 = int_to_ptr.vmem [resolvable:$true] %s15_s10 }
   0x3   :  { %p53_p1 = scmp.lt.u32.totalorder %s49_s13, %s141_s0 }
   0x5   :  { %p55_p2 = pnand %p53_p1, %p50_p0 }
   0x7   :  { %58 = shalt.err (!%p55_p2)
}
   0x8   :  { %s59_s18 = scalar_lea.vmem %s16_s10, 32  ;;  %p64_p4 = scmp.lt.s32.totalorder %s16_s10, %s16_s10 }
   0x9   :  { %p60_p3 = scmp.ne.s32.totalorder %s16_s10, %s59_s18  ;;  %p65_p5 = scmp.lt.s32.totalorder %s59_s18, %s59_s18 }
   0xb   :  { %p66_p6 = por %p65_p5, %p64_p4 }
   0xd   :  { %p67_p7 = pnand %p66_p6, %p60_p3 }
   0xf   :  { %70 = shalt.err (!%p67_p7)
}
  0x10   :  { %18 = dma.hbm_to_vmem [thread:$0]  %s141_s0, 32, %s16_s10, [#allocation3]  }
  0x11   :  { %93 = dma.done.wait [#allocation3], 32  }
  0x12   :  { %94 = vsyncadd [#allocation3], 4294967264  ;;  %v24_v0 = vld [vmem:[#allocation2] sm:$0x3]  ;;  %s98_s23 = smov [#allocation5]  }
  0x13   :  { %v25_v1 = vld [vmem:[%s142_s1] sm:$0x3]  ;;  %s38_s24 = sshll.u32 %s98_s23, 4  ;;  %s39_s24 = int_to_ptr.vmem [resolvable:$true] %s38_s24 }
  0x14   :  { %v26_v2 = vmul.f32 %v25_v1, %v24_v0  ;;  %s71_s25 = scalar_lea.vmem %s39_s24, 16  ;;  %s75_s26 = scalar_lea.vmem %s39_s24, 32 }
  0x15   :  { %p72_p8 = scmp.ne.s32.totalorder %s39_s24, %s71_s25  ;;  %p76_p9 = scmp.lt.s32.totalorder %s39_s24, %s39_s24 }
  0x16   :  { %v28_v3 = vrot.slane %v26_v2, 1  ;;  %p77_p10 = scmp.lt.s32.totalorder %s75_s26, %s71_s25 }
  0x18   :  { %v30_v4 = vadd.f32 %v28_v3, %v26_v2  ;;  %p78_p11 = por %p77_p10, %p76_p9 }
  0x1a   :  { %31 = vst [vmem:[#allocation5] sm:$0x1] %v30_v4  ;;  %p79_p12 = pnand %p78_p11, %p72_p8 }
  0x1c   :  { %82 = shalt.err (!%p79_p12)
}
  0x1d   :  { %s83_s28 = scalar_lea.hbm %s143_s2, 16 }
  0x1e   :  { %p84_p13 = scmp.ne.s32.totalorder %s143_s2, %s83_s28  ;;  %p87_p0 = scmp.lt.u32.totalorder %s83_s28, %s143_s2 }
  0x20   :  { %p89_p1 = pnand %p87_p0, %p84_p13 }
  0x22   :  { %92 = shalt.err (!%p89_p1)
}
  0x23   :  { %41 = dma.vmem_to_hbm [thread:$0]  %s39_s24, 16, %s143_s2, [#allocation4]  }
  0x24   :  { %95 = dma.done.wait [#allocation4], 16  }
  0x25   :  { %96 = vsyncadd [#allocation4], 4294967280 }
  0x26   :  { %45 = vsyncpa [#allocation3], 1 }
  0x27   :  { %46 = vsyncpa [#allocation4], 1 }

</bundles_post_ra>
